<compile_context>
chip_gen: v7x
topology: tpu7x:2x2x1
jax: 0.10.0
libtpu: 0.0.40
codegen_flags: <defaults>
</compile_context>

<pallas_src>
import math

import numpy as np

import jax
import jax.numpy as jnp
from jax.experimental import pallas as pl
from jax.experimental.pallas import tpu as pltpu


def _dropout_nd_kernel(x_ref, m_ref, o_ref):
    # x_ref: (bd_tile, l_tile) tile of X viewed as (B*D, L), in X's dtype.
    # m_ref: (bd_tile, 1) tied mask column, f32, values in {0, 1/(1-p)}.
    # Multiply in f32 so 1/(1-p) is exact for low-precision X; the kernel is
    # HBM-bound so the extra casts ride in otherwise-idle VPU slots.
    x = x_ref[...].astype(jnp.float32)
    o_ref[...] = (x * m_ref[...]).astype(o_ref.dtype)


def _round_up(n, m):
    return ((n + m - 1) // m) * m


def _pick_tiles(bd, l, itemsize):
    """Tile sizes for the (rows=B*D, length=L) view.

    Returns (bd_tile, l_tile) with:
      * l_tile a multiple of 128 (or the full dim if L < 128), capped so a
        row of lanes is ~8 KiB (2048 f32 / 4096 bf16 / 8192 int8),
      * bd_tile a multiple of the dtype-aware sublane floor (8/16/32), <= 512,
      * block dims never exceeding the array dims (ragged edges handled by a
        pl.cdiv grid),
      * >=2 grid steps along one parallel axis when the problem allows, so
        both v7x TensorCores stream data.
    Max tile = 512 * 8 KiB = 4 MiB for any dtype.
    """
    row_min = max(8, 32 // itemsize)          # 8 f32 / 16 bf16 / 32 int8-fp8
    lane_cap = 8192 // itemsize               # ~8 KiB of lanes per sublane row

    if l >= 128:
        l_tile = min(lane_cap, (l // 128) * 128)   # 128-aligned, <= L
    else:
        l_tile = l                                 # full (tiny) dim is legal

    if bd >= row_min:
        bd_tile = min(512, (bd // row_min) * row_min)
    else:
        bd_tile = bd                               # full (tiny) dim is legal

    # Guarantee >=2 grid steps on a parallel axis for megacore sharding.
    if pl.cdiv(bd, bd_tile) == 1 and pl.cdiv(l, l_tile) == 1:
        if bd >= 2 * row_min:
            bd_tile = _round_up(pl.cdiv(bd, 2), row_min)
        elif l >= 256:
            l_tile = _round_up(pl.cdiv(l, 2), 128)

    return bd_tile, l_tile


def dropout_nd(x, *, p: float = 0.5, key=None, training: bool = True,
               tie: bool = True, transposed: bool = True):
    """JAX/Pallas equivalent of DropoutNd.forward for X of shape (B, D, lengths...)."""
    if p < 0.0 or p >= 1.0:
        raise ValueError(
            "dropout probability has to be in [0, 1), but got {}".format(p))
    if not training:
        # Eval path: identity (same as the PyTorch module).
        return x
    assert tie and transposed, (
        "kernel implements the module defaults (tie=True, transposed=True)")
    # TODO(synk): tie=False / transposed=False variants (full-shape mask,
    # axis rearrange) are not implemented in the Pallas path.
    assert x.ndim >= 3, "expected X of shape (batch, dim, lengths...)"

    if key is None:
        key = jax.random.PRNGKey(0)

    B, D = x.shape[0], x.shape[1]
    L = math.prod(x.shape[2:])
    BD = B * D
    itemsize = np.dtype(x.dtype).itemsize
    x2 = x.reshape(BD, L)

    # Tied mask: one Bernoulli(1-p) keep decision per (batch, dim) row,
    # pre-scaled by 1/(1-p).  Kept in f32 so E[y] is exactly unbiased even
    # when X is bf16 and 1/(1-p) is not bf16-representable.
    keep = jax.random.uniform(key, (BD, 1)) < jnp.float32(1.0 - p)
    mask = jnp.where(keep, jnp.float32(1.0 / (1.0 - p)), jnp.float32(0.0))

    bd_tile, l_tile = _pick_tiles(BD, L, itemsize)
    # Ragged edges (when tiles don't divide the dims) are masked by Pallas.
    grid = (pl.cdiv(BD, bd_tile), pl.cdiv(L, l_tile))

    y2 = pl.pallas_call(
        _dropout_nd_kernel,
        out_shape=jax.ShapeDtypeStruct((BD, L), x.dtype),
        grid=grid,
        in_specs=[
            # X tile: same block index as the output -> safe to alias in/out.
            pl.BlockSpec((bd_tile, l_tile), lambda i, j: (i, j)),
            # Mask column: index_map constant across the inner length axis,
            # so the block stays resident (one tiny DMA per row tile).
            pl.BlockSpec((bd_tile, 1), lambda i, j: (i, 0)),
        ],
        out_specs=pl.BlockSpec((bd_tile, l_tile), lambda i, j: (i, j)),
        # Let a donating caller reuse X's buffer for the output (halves the
        # op's HBM footprint in training graphs; XLA copies if X is still live).
        input_output_aliases={0: 0},
        # Purely memory-bound: 1 read + 1 write of X plus the tiny mask.
        cost_estimate=pl.CostEstimate(
            flops=BD * L,
            transcendentals=0,
            bytes_accessed=2 * BD * L * itemsize + BD * 4),
        compiler_params=pltpu.CompilerParams(
            dimension_semantics=("parallel", "parallel"),
            # Explicit scoped-VMEM budget: ~16 MiB of double-buffered tiles
            # overshoots v5e's 16 MiB default cap; 32 MiB covers it and stays
            # well under v7x's 64 MiB physical VMEM.
            vmem_limit_bytes=32 * 1024 * 1024),
    )(x2, mask)

    # TODO(synk): optional row-gather variant (scalar-prefetched kept-row ids)
    # to skip reading dropped rows entirely for large p and very long L.
    return y2.reshape(x.shape)


if __name__ == "__main__":
    p = 0.5
    scale = 1.0 / (1.0 - p)
    root_key = jax.random.PRNGKey(0)

    def run_and_check(B, D, L, tag):
        kx, km = jax.random.split(
            jax.random.fold_in(root_key, B * 10000 + D * 100 + L))
        x = jax.random.normal(kx, (B, D, L), dtype=jnp.float32)

        # Training path (applies the tied dropout mask).
        y = jax.block_until_ready(dropout_nd(x, p=p, key=km, training=True))
        xn, yn = np.asarray(x), np.asarray(y)
        assert yn.shape == xn.shape, f"[{tag}] shape mismatch"

        # tie=True: every (b, d) row is either all-zero or x * 1/(1-p).
        for b in range(B):
            for d in range(D):
                row_zero = np.allclose(yn[b, d], 0.0)
                row_scaled = np.allclose(yn[b, d], xn[b, d] * scale,
                                         rtol=1e-5, atol=1e-5)
                assert row_zero or row_scaled, (
                    f"[{tag}] mask is not tied across the length axis at ({b},{d})")

        # Eval path is identity.
        y_eval = jax.block_until_ready(dropout_nd(x, p=p, key=km, training=False))
        assert np.allclose(np.asarray(y_eval), xn), f"[{tag}] eval path is not identity"

    # Small case: full-array block, grid (1, 1).
    run_and_check(2, 4, 16, "small")
    # Moderate case: exercises the megacore row split -> grid (2, 1) with a
    # ragged final row block (24 rows -> 16 + 8).
    run_and_check(3, 8, 384, "row_split")
    # Ragged length case: exercises the cdiv lane grid -> (1, 2) with a
    # masked final lane block (200 -> 128 + 72).
    run_and_check(2, 8, 200, "ragged_len")

    print("KERNEL_OK")
</pallas_src>

<mosaic_0001>
module attributes {stable_mosaic.version = 11 : i64} {
  func.func @_dropout_nd_kernel(%arg0: i32, %arg1: i32, %arg2: memref<8x16xf32, #tpu.memory_space<vmem>>, %arg3: memref<8x1xf32, #tpu.memory_space<vmem>>, %arg4: memref<8x16xf32, #tpu.memory_space<vmem>>) attributes {dimension_semantics = [#tpu.dimension_semantics<parallel>, #tpu.dimension_semantics<parallel>], iteration_bounds = array<i64: 1, 1>, scalar_prefetch = 0 : i64, scratch_operands = 0 : i64, tpu.core_type = #tpu.core_type<tc>, window_params = [{transform_indices = @transform_0, window_bounds = array<i64: 8, 16>}, {transform_indices = @transform_1, window_bounds = array<i64: 8, 1>}, {transform_indices = @transform_2, window_bounds = array<i64: 8, 16>}]} {
    %c0 = arith.constant 0 : index
    %c0_0 = arith.constant 0 : index
    %0 = vector.load %arg2[%c0, %c0_0] : memref<8x16xf32, #tpu.memory_space<vmem>>, vector<8x16xf32>
    %c0_1 = arith.constant 0 : index
    %c0_2 = arith.constant 0 : index
    %1 = vector.load %arg3[%c0_1, %c0_2] : memref<8x1xf32, #tpu.memory_space<vmem>>, vector<8x1xf32>
    %2 = vector.broadcast %1 : vector<8x1xf32> to vector<8x16xf32>
    %3 = arith.mulf %0, %2 : vector<8x16xf32>
    %c0_3 = arith.constant 0 : index
    %c0_4 = arith.constant 0 : index
    %4 = vector.load %arg4[%c0_3, %c0_4] : memref<8x16xf32, #tpu.memory_space<vmem>>, vector<8x16xf32>
    tpu.vector_store %arg4[%c0_3, %c0_4], %3 {strides = array<i32>} : memref<8x16xf32, #tpu.memory_space<vmem>>, vector<8x16xf32>,
    return
  }
  func.func @transform_0(%arg0: i32, %arg1: i32) -> (i32, i32) {
    %c0_i32 = arith.constant 0 : i32
    return %arg0, %arg1 : i32, i32
  }
  func.func @transform_1(%arg0: i32, %arg1: i32) -> (i32, i32) {
    %c0_i32 = arith.constant 0 : i32
    %c0_i32_0 = arith.constant 0 : i32
    return %arg0, %c0_i32 : i32, i32
  }
  func.func @transform_2(%arg0: i32, %arg1: i32) -> (i32, i32) {
    %c0_i32 = arith.constant 0 : i32
    return %arg0, %arg1 : i32, i32
  }
}

</mosaic_0001>

<bundles_post_ra>
// kernel: tpu_custom_call.1
= control target key start
LH: loop header
LB: loop body
LE: loop exit
PB: predicated region body
PF: predicated region fallthrough
CT: control target
= control target key end

     0   :  { %7 = vsyncpa [#allocation3], 0  ;;  %s146_s0 = inlined_call_operand.hbm [shape: f32[8,16], index: 0, kind: input, shape index: {}, may-alias: {0,2}]   ;;  %s147_s1 = inlined_call_operand.vmem [shape: f32[8,1], index: 1, kind: input, shape index: {}]   ;;  %s148_s2 = inlined_call_operand.hbm [shape: f32[8,16], index: 2, kind: output, shape index: {}, may-alias: {0,2}]  }
   0x1   :  { %8 = vsyncpa [#allocation4], 0  ;;  %s101_s9 = smov [#allocation2]   ;;  %s53_s13 = scalar_lea.hbm %s146_s0, 128 }
   0x2   :  { %s15_s10 = sshll.u32 %s101_s9, 4  ;;  %p54_p0 = scmp.ne.s32.totalorder %s146_s0, %s53_s13  ;;  %s16_s10 = int_to_ptr.vmem [resolvable:$true] %s15_s10 }
   0x3   :  { %p57_p1 = scmp.lt.u32.totalorder %s53_s13, %s146_s0 }
   0x5   :  { %p59_p2 = pnand %p57_p1, %p54_p0 }
   0x7   :  { %62 = shalt.err (!%p59_p2)
}
   0x8   :  { %s63_s18 = scalar_lea.vmem %s16_s10, 128  ;;  %p68_p4 = scmp.lt.s32.totalorder %s16_s10, %s16_s10 }
   0x9   :  { %p64_p3 = scmp.ne.s32.totalorder %s16_s10, %s63_s18  ;;  %p69_p5 = scmp.lt.s32.totalorder %s63_s18, %s63_s18 }
   0xb   :  { %p70_p6 = por %p69_p5, %p68_p4 }
   0xd   :  { %p71_p7 = pnand %p70_p6, %p64_p3 }
   0xf   :  { %74 = shalt.err (!%p71_p7)
}
  0x10   :  { %18 = dma.hbm_to_vmem [thread:$0]  %s146_s0, 128, %s16_s10, [#allocation3]  }
  0x11   :  { %97 = dma.done.wait [#allocation3], 128  }
  0x12   :  { %98 = vsyncadd [#allocation3], 4294967168  ;;  %v102_v0 = vmov 0   ;;  %v25_v1 = vld [vmem:[%s147_s1] sm:$0xff]  ;;  %s103_s23 = smov [#allocation5]   ;;  %vm32_vm0 = vcmask 130048  }
  0x13   :  { %52 = vset.pattern.permute.xlu0 %v102_v0  ;;  %v24_v2 = vld [vmem:[#allocation2] sm:$0xff]  ;;  %s40_s24 = sshll.u32 %s103_s23, 4  ;;  %s41_s24 = int_to_ptr.vmem [resolvable:$true] %s40_s24 }
  0x14   :  { %28 = vperm.xlu0 %52, %v25_v1   ;;  %s75_s25 = scalar_lea.vmem %s41_s24, 128  ;;  %p80_p9 = scmp.lt.s32.totalorder %s41_s24, %s41_s24 }
  0x15   :  { %p76_p8 = scmp.ne.s32.totalorder %s41_s24, %s75_s25  ;;  %p81_p10 = scmp.lt.s32.totalorder %s75_s25, %s75_s25 }
  0x17   :  { %p82_p11 = por %p81_p10, %p80_p9 }
  0x19   :  { %p83_p12 = pnand %p82_p11, %p76_p8 }
  0x93   :  { %v29_v3 = vpop.permute.xlu0 %28 }
  0x94   :  { %v31_v4 = vmul.f32 %v29_v3, %v24_v2 }
  0x96   :  { %33 = vst.msk [vmem:[#allocation5] sm:$0xff] %vm32_vm0, %v31_v4 }
  0x97   :  { %86 = shalt.err (!%p83_p12)
}
  0x98   :  { %s87_s1 = scalar_lea.hbm %s148_s2, 128 }
  0x99   :  { %p88_p13 = scmp.ne.s32.totalorder %s148_s2, %s87_s1  ;;  %p91_p0 = scmp.lt.u32.totalorder %s87_s1, %s148_s2 }
  0x9b   :  { %p93_p1 = pnand %p91_p0, %p88_p13 }
  0x9d   :  { %96 = shalt.err (!%p93_p1)
}
  0x9e   :  { %43 = dma.vmem_to_hbm [thread:$0]  %s41_s24, 128, %s148_s2, [#allocation4]  }
  0x9f   :  { %99 = dma.done.wait [#allocation4], 128  }
  0xa0   :  { %100 = vsyncadd [#allocation4], 4294967168 }
  0xa1   :  { %47 = vsyncpa [#allocation3], 1 }
  0xa2   :  { %48 = vsyncpa [#allocation4], 1 }

</bundles_post_ra>
